<compile_context>
chip_gen: v5e
topology: v5e:2x2
jax: 0.10.0
libtpu: 0.0.40
codegen_flags: <defaults>
</compile_context>

<pallas_src>
import functools

import jax
import jax.numpy as jnp
from jax.experimental import pallas as pl
from jax.experimental.pallas import tpu as pltpu


def _round_up(v, m):
    return (v + m - 1) // m * m


def _vmem_capacity_bytes():
    """Physical VMEM per core; conservative fallback if the query fails."""
    try:
        info = pltpu.get_tpu_info()
        cap = getattr(info, "vmem_capacity_bytes", None)
        if cap:
            return int(cap)
    except Exception:
        pass
    return 64 * 1024 * 1024  # v7x per-TC VMEM (smallest of the targets)


def _lora_kernel(*refs, has_base):
    # refs: x (tile_m, in), A_t (in, rank_p), B_t (rank_p, tile_n),
    #       [base (tile_m, tile_n)], out (tile_m, tile_n), xa scratch.
    if has_base:
        x_ref, at_ref, bt_ref, base_ref, o_ref, xa_ref = refs
    else:
        x_ref, at_ref, bt_ref, o_ref, xa_ref = refs
        base_ref = None

    # x @ A_t once per row tile (inner j axis == 0), cached in VMEM scratch and
    # reused across all out_features tiles.
    @pl.when(pl.program_id(1) == 0)
    def _():
        xa = jnp.dot(x_ref[...], at_ref[...], preferred_element_type=jnp.float32)
        xa_ref[...] = xa.astype(xa_ref.dtype)  # narrow intermediate (bf16)

    y = jnp.dot(xa_ref[...], bt_ref[...], preferred_element_type=jnp.float32)
    if base_ref is not None:
        y = y + base_ref[...].astype(jnp.float32)
    o_ref[...] = y.astype(o_ref.dtype)


def prepare_lora_weights(A, B, compute_dtype=jnp.bfloat16):
    """One-time per-adapter layout work: A.T / B.T, pad rank & out to 128, cast.

    Call once per adapter (outside any step / jit body) and pass the result to
    lora_apply(); avoids re-transposing / re-padding the static weights per call.
    """
    rank, in_features = A.shape
    out_features, rank_b = B.shape
    assert rank_b == rank
    rank_p = _round_up(rank, 128)
    out_p = _round_up(out_features, 128)
    A_t = A.T.astype(compute_dtype)  # (in, rank)
    B_t = B.T.astype(compute_dtype)  # (rank, out)
    if rank_p != rank:
        A_t = jnp.pad(A_t, ((0, 0), (0, rank_p - rank)))
        B_t = jnp.pad(B_t, ((0, rank_p - rank), (0, 0)))
    if out_p != out_features:
        B_t = jnp.pad(B_t, ((0, 0), (0, out_p - out_features)))
    return A_t, B_t, out_features


def lora_apply(x, prepared, *, base=None, max_tile_m=1024):
    """y = [base +] x @ A.T @ B.T with prepared = prepare_lora_weights(A, B)."""
    A_t, B_t, out_features = prepared
    in_features, rank_p = A_t.shape
    _, out_p = B_t.shape
    assert x.shape[-1] == in_features
    compute_dtype = A_t.dtype

    lead = x.shape[:-1]
    out_store_dtype = base.dtype if base is not None else x.dtype
    x2d = x.reshape(-1, in_features).astype(compute_dtype)
    M = x2d.shape[0]

    base2d = None
    if base is not None:
        assert base.shape == (*lead, out_features)
        base2d = base.reshape(-1, out_features)

    # ---- per-generation VMEM sizing --------------------------------------
    SUB = 16  # bf16 sublane multiple (also a multiple of the f32 sublane 8)
    w_item = jnp.dtype(compute_dtype).itemsize
    o_item = jnp.dtype(out_store_dtype).itemsize
    vmem_cap = _vmem_capacity_bytes()
    vmem_limit = min(vmem_cap * 3 // 4, 96 * 1024 * 1024)  # 48MiB v7x, 96MiB v5e/v6e

    # out_features tiling: keep the resident B_t block under ~1/4 of the limit.
    k_blocks = out_p // 128
    max_blocks = max(1, (vmem_limit // 4) // max(1, rank_p * w_item * 128))
    n_blocks = min(k_blocks, max_blocks)
    while k_blocks % n_blocks != 0:
        n_blocks -= 1
    tile_n = n_blocks * 128
    grid_n = out_p // tile_n

    # tile_m budget includes the resident weights and the f32 temporaries.
    weight_bytes = (in_features * rank_p + 2 * rank_p * tile_n) * w_item
    row_bytes = (2 * in_features * w_item          # x tile (double-buffered)
                 + 2 * tile_n * o_item             # out tile (double-buffered)
                 + (2 * tile_n * o_item if base2d is not None else 0)
                 + rank_p * w_item                 # xa scratch row
                 + tile_n * 4 + rank_p * 4)        # in-kernel f32 temporaries
    budget = int(vmem_limit * 0.85) - weight_bytes
    cap_rows = budget // row_bytes
    cap_rows = max(SUB, (cap_rows // SUB) * SUB)
    tile_m = int(min(max_tile_m, cap_rows, _round_up(M, SUB)))
    tile_m = max(SUB, (tile_m // SUB) * SUB)

    # v7x: guarantee >= 2 row tiles when M allows, so both TensorCores get work.
    M_sub = _round_up(M, SUB)
    if M_sub >= 2 * SUB:
        tile_m = min(tile_m, _round_up(pl.cdiv(M_sub, 2), SUB))

    M_p = _round_up(M, tile_m)
    grid_m = M_p // tile_m

    if M_p != M:
        x2d = jnp.pad(x2d, ((0, M_p - M), (0, 0)))
    if base2d is not None and (M_p != M or out_p != out_features):
        base2d = jnp.pad(base2d, ((0, M_p - M), (0, out_p - out_features)))

    has_base = base2d is not None

    def build_call(single_buffer_weights):
        def wspec(shape, imap, single):
            if single:
                return pl.BlockSpec(shape, imap, pipeline_mode=pl.Buffered(1))
            return pl.BlockSpec(shape, imap)

        in_specs = [
            # x row tile: index map independent of j -> DMA'd once per i.
            pl.BlockSpec((tile_m, in_features), lambda i, j: (i, 0)),
            # A_t: constant block index -> VMEM resident, single-buffered.
            wspec((in_features, rank_p), lambda i, j: (0, 0),
                  single_buffer_weights),
            # B_t: resident when grid_n == 1, otherwise streamed over j.
            wspec((rank_p, tile_n), lambda i, j: (0, j),
                  single_buffer_weights and grid_n == 1),
        ]
        io_aliases = {}
        if has_base:
            in_specs.append(pl.BlockSpec((tile_m, tile_n), lambda i, j: (i, j)))
            io_aliases = {3: 0}  # base buffer reused as the output buffer
        return pl.pallas_call(
            functools.partial(_lora_kernel, has_base=has_base),
            out_shape=jax.ShapeDtypeStruct((M_p, out_p), out_store_dtype),
            grid=(grid_m, grid_n),
            in_specs=in_specs,
            out_specs=pl.BlockSpec((tile_m, tile_n), lambda i, j: (i, j)),
            scratch_shapes=[pltpu.VMEM((tile_m, rank_p), compute_dtype)],
            input_output_aliases=io_aliases,
            compiler_params=pltpu.CompilerParams(
                dimension_semantics=("parallel", "arbitrary"),
                vmem_limit_bytes=int(vmem_limit),
            ),
        )

    args = (x2d, A_t, B_t) + ((base2d,) if has_base else ())
    try:
        y2d = build_call(True)(*args)
    except Exception:
        # pipeline_mode=pl.Buffered(1) not supported by this jax -> default.
        y2d = build_call(False)(*args)

    if M_p != M or out_p != out_features:
        y2d = y2d[:M, :out_features]
    return y2d.reshape(*lead, out_features)


def lora_forward(x, A, B, *, base=None, compute_dtype=jnp.bfloat16,
                 max_tile_m=1024):
    """Convenience wrapper: y = [base +] x @ A.T @ B.T (LoRAModule.forward).

    For adapters reused across steps, prepare_lora_weights() once and call
    lora_apply() directly to keep the weight layout work out of the hot path.
    """
    prepared = prepare_lora_weights(A, B, compute_dtype)
    return lora_apply(x, prepared, base=base, max_tile_m=max_tile_m)


def _lora_ref(x, A, B, dt=jnp.bfloat16):
    """Pure-JAX reference emulating the kernel's bf16 streaming / f32 accum."""
    xa = jnp.dot(x.astype(dt), A.T.astype(dt), preferred_element_type=jnp.float32)
    return jnp.dot(xa.astype(dt), B.T.astype(dt), preferred_element_type=jnp.float32)


if __name__ == "__main__":
    # Small shapes consistent with the module: LoRA (rank=4) on Linear layers,
    # activations (batch=2, seq=8, hidden=32), plus a LoRAMTE-style forward.
    batch, seq, in_features, out_features, rank = 2, 8, 32, 32, 4

    key = jax.random.PRNGKey(0)
    (kx, ka, kb, ka1, kb1, ka2, kb2, kw1, kw2, kximg) = jax.random.split(key, 10)

    x = jax.random.normal(kx, (batch, seq, in_features), dtype=jnp.float32)
    # Faithful LoRAModule init: A ~ randn, B = zeros -> output exactly zero.
    A = jax.random.normal(ka, (rank, in_features), dtype=jnp.float32)
    B = jnp.zeros((out_features, rank), dtype=jnp.float32)

    y = lora_forward(x, A, B)
    jax.block_until_ready(y)
    assert y.shape == (batch, seq, out_features)
    assert jnp.allclose(y, jnp.zeros_like(y), atol=1e-6)

    # Nonzero B: bf16-streamed kernel vs bf16-emulated reference (tight), and
    # f32 compute mode vs the exact f32 reference (tighter).
    B_nz = 0.1 * jax.random.normal(kb, (out_features, rank), dtype=jnp.float32)
    y_bf16 = lora_forward(x, A, B_nz)
    jax.block_until_ready(y_bf16)
    assert jnp.allclose(y_bf16, _lora_ref(x, A, B_nz), atol=5e-3, rtol=5e-3)

    y_f32 = lora_forward(x, A, B_nz, compute_dtype=jnp.float32)
    jax.block_until_ready(y_f32)
    assert jnp.allclose(y_f32, x @ A.T @ B_nz.T, atol=1e-4, rtol=1e-4)

    # --- LoRAMTE-style forward: frozen tiny core model (Linear, ReLU, Linear),
    # LoRA branch + base Linear output fused in the Pallas kernel, log_softmax.
    hidden, classes = 64, 10
    W1 = 0.1 * jax.random.normal(kw1, (hidden, in_features), dtype=jnp.float32)
    b1 = jnp.zeros((hidden,), jnp.float32)
    W2 = 0.1 * jax.random.normal(kw2, (classes, hidden), dtype=jnp.float32)
    b2 = jnp.zeros((classes,), jnp.float32)
    A1 = jax.random.normal(ka1, (rank, in_features), dtype=jnp.float32)
    B1 = 0.05 * jax.random.normal(kb1, (hidden, rank), dtype=jnp.float32)
    A2 = jax.random.normal(ka2, (rank, hidden), dtype=jnp.float32)
    B2 = 0.05 * jax.random.normal(kb2, (classes, rank), dtype=jnp.float32)

    # Adapter weights prepared once (per task / per layer), outside the call path.
    prep1 = prepare_lora_weights(A1, B1)
    prep2 = prepare_lora_weights(A2, B2)

    # TODO(synk): core Linear / ReLU layers, log_softmax and the per-task
    # ModuleDict adapter caching (get_reduction) stay in plain JAX; only the
    # LoRA branch fused with the base-output add runs through the Pallas kernel.
    def loramte_forward_pallas(x_img):
        h = x_img.reshape(x_img.shape[0], -1)          # x.view(x.size(0), -1)
        h = lora_apply(h, prep1, base=h @ W1.T + b1)   # Linear + LoRA (fused add)
        h = jnp.maximum(h, 0.0)                        # non-Linear layer: no LoRA
        h = lora_apply(h, prep2, base=h @ W2.T + b2)   # Linear + LoRA (fused add)
        return jax.nn.log_softmax(h, axis=1)

    def loramte_forward_ref(x_img):
        h = x_img.reshape(x_img.shape[0], -1)
        h = h @ W1.T + b1 + _lora_ref(h, A1, B1)
        h = jnp.maximum(h, 0.0)
        h = h @ W2.T + b2 + _lora_ref(h, A2, B2)
        return jax.nn.log_softmax(h, axis=1)

    x_img = jax.random.normal(kximg, (batch, 1, 4, 8), dtype=jnp.float32)
    out_pallas = loramte_forward_pallas(x_img)
    out_ref = loramte_forward_ref(x_img)
    jax.block_until_ready(out_pallas)
    assert out_pallas.shape == (batch, classes)
    assert jnp.allclose(out_pallas, out_ref, atol=1e-2, rtol=1e-2)

    print("KERNEL_OK")
</pallas_src>

<mosaic_0001>
module attributes {stable_mosaic.version = 11 : i64} {
  func.func @_lora_kernel(%arg0: i32, %arg1: i32, %arg2: memref<16x32xbf16, #tpu.memory_space<vmem>>, %arg3: memref<32x128xbf16, #tpu.memory_space<vmem>>, %arg4: memref<128x128xbf16, #tpu.memory_space<vmem>>, %arg5: memref<16x128xf32, #tpu.memory_space<vmem>>, %arg6: memref<16x128xbf16, #tpu.memory_space<vmem>>) attributes {dimension_semantics = [#tpu.dimension_semantics<parallel>, #tpu.dimension_semantics<arbitrary>], iteration_bounds = array<i64: 1, 1>, scalar_prefetch = 0 : i64, scratch_operands = 1 : i64, tpu.core_type = #tpu.core_type<tc>, window_params = [{transform_indices = @transform_0, window_bounds = array<i64: 16, 32>}, {pipeline_mode = #tpu.pipeline_mode<synchronous>, transform_indices = @transform_1, window_bounds = array<i64: 32, 128>}, {pipeline_mode = #tpu.pipeline_mode<synchronous>, transform_indices = @transform_2, window_bounds = array<i64: 128, 128>}, {transform_indices = @transform_3, window_bounds = array<i64: 16, 128>}]} {
    %c0_i32 = arith.constant 0 : i32
    %0 = arith.cmpi eq, %arg1, %c0_i32 : i32
    %1 = arith.extui %0 : i1 to i32
    %c0_i32_0 = arith.constant 0 : i32
    %2 = arith.cmpi ne, %1, %c0_i32_0 : i32
    scf.if %2 {
      %c0_6 = arith.constant 0 : index
      %c0_7 = arith.constant 0 : index
      %7 = vector.load %arg2[%c0_6, %c0_7] : memref<16x32xbf16, #tpu.memory_space<vmem>>, vector<16x32xbf16>
      %c0_8 = arith.constant 0 : index
      %c0_9 = arith.constant 0 : index
      %8 = vector.load %arg3[%c0_8, %c0_9] : memref<32x128xbf16, #tpu.memory_space<vmem>>, vector<32x128xbf16>
      %cst_10 = arith.constant dense<0.000000e+00> : vector<16x128xf32>
      %9 = tpu.matmul %7, %8, %cst_10 {dimension_numbers = #tpu.dot_dimension_numbers<[1], [0], [0], [1], [0, 0, 1, 1], [], []>} : vector<16x32xbf16>, vector<32x128xbf16>, vector<16x128xf32> -> vector<16x128xf32>
      %10 = arith.truncf %9 : vector<16x128xf32> to vector<16x128xbf16>
      %c0_11 = arith.constant 0 : index
      %c0_12 = arith.constant 0 : index
      %11 = vector.load %arg6[%c0_11, %c0_12] : memref<16x128xbf16, #tpu.memory_space<vmem>>, vector<16x128xbf16>
      tpu.vector_store %arg6[%c0_11, %c0_12], %10 {strides = array<i32>} : memref<16x128xbf16, #tpu.memory_space<vmem>>, vector<16x128xbf16>,
    } else {
    }
    %c0 = arith.constant 0 : index
    %c0_1 = arith.constant 0 : index
    %3 = vector.load %arg6[%c0, %c0_1] : memref<16x128xbf16, #tpu.memory_space<vmem>>, vector<16x128xbf16>
    %c0_2 = arith.constant 0 : index
    %c0_3 = arith.constant 0 : index
    %4 = vector.load %arg4[%c0_2, %c0_3] : memref<128x128xbf16, #tpu.memory_space<vmem>>, vector<128x128xbf16>
    %cst = arith.constant dense<0.000000e+00> : vector<16x128xf32>
    %5 = tpu.matmul %3, %4, %cst {dimension_numbers = #tpu.dot_dimension_numbers<[1], [0], [0], [1], [0, 0, 1, 1], [], []>} : vector<16x128xbf16>, vector<128x128xbf16>, vector<16x128xf32> -> vector<16x128xf32>
    %c0_4 = arith.constant 0 : index
    %c0_5 = arith.constant 0 : index
    %6 = vector.load %arg5[%c0_4, %c0_5] : memref<16x128xf32, #tpu.memory_space<vmem>>, vector<16x128xf32>
    tpu.vector_store %arg5[%c0_4, %c0_5], %5 {strides = array<i32>} : memref<16x128xf32, #tpu.memory_space<vmem>>, vector<16x128xf32>,
    return
  }
  func.func @transform_0(%arg0: i32, %arg1: i32) -> (i32, i32) {
    %c0_i32 = arith.constant 0 : i32
    %c0_i32_0 = arith.constant 0 : i32
    return %arg0, %c0_i32 : i32, i32
  }
  func.func @transform_1(%arg0: i32, %arg1: i32) -> (i32, i32) {
    %c0_i32 = arith.constant 0 : i32
    %c0_i32_0 = arith.constant 0 : i32
    %c0_i32_1 = arith.constant 0 : i32
    return %c0_i32, %c0_i32_0 : i32, i32
  }
  func.func @transform_2(%arg0: i32, %arg1: i32) -> (i32, i32) {
    %c0_i32 = arith.constant 0 : i32
    %c0_i32_0 = arith.constant 0 : i32
    return %c0_i32, %arg1 : i32, i32
  }
  func.func @transform_3(%arg0: i32, %arg1: i32) -> (i32, i32) {
    %c0_i32 = arith.constant 0 : i32
    return %arg0, %arg1 : i32, i32
  }
}

module attributes {stable_mosaic.version = 11 : i64} {
  func.func @_lora_kernel(%arg0: i32, %arg1: i32, %arg2: memref<16x32xbf16, #tpu.memory_space<vmem>>, %arg3: memref<32x128xbf16, #tpu.memory_space<vmem>>, %arg4: memref<128x128xbf16, #tpu.memory_space<vmem>>, %arg5: memref<16x128xf32, #tpu.memory_space<vmem>>, %arg6: memref<16x128xbf16, #tpu.memory_space<vmem>>) attributes {dimension_semantics = [#tpu.dimension_semantics<parallel>, #tpu.dimension_semantics<arbitrary>], iteration_bounds = array<i64: 1, 1>, scalar_prefetch = 0 : i64, scratch_operands = 1 : i64, tpu.core_type = #tpu.core_type<tc>, window_params = [{transform_indices = @transform_0, window_bounds = array<i64: 16, 32>}, {pipeline_mode = #tpu.pipeline_mode<synchronous>, transform_indices = @transform_1, window_bounds = array<i64: 32, 128>}, {transform_indices = @transform_2, window_bounds = array<i64: 128, 128>}, {transform_indices = @transform_3, window_bounds = array<i64: 16, 128>}]} {
    %c0_i32 = arith.constant 0 : i32
    %0 = arith.cmpi eq, %arg1, %c0_i32 : i32
    %1 = arith.extui %0 : i1 to i32
    %c0_i32_0 = arith.constant 0 : i32
    %2 = arith.cmpi ne, %1, %c0_i32_0 : i32
    scf.if %2 {
      %c0_6 = arith.constant 0 : index
      %c0_7 = arith.constant 0 : index
      %7 = vector.load %arg2[%c0_6, %c0_7] : memref<16x32xbf16, #tpu.memory_space<vmem>>, vector<16x32xbf16>
      %c0_8 = arith.constant 0 : index
      %c0_9 = arith.constant 0 : index
      %8 = vector.load %arg3[%c0_8, %c0_9] : memref<32x128xbf16, #tpu.memory_space<vmem>>, vector<32x128xbf16>
      %cst_10 = arith.constant dense<0.000000e+00> : vector<16x128xf32>
      %9 = tpu.matmul %7, %8, %cst_10 {dimension_numbers = #tpu.dot_dimension_numbers<[1], [0], [0], [1], [0, 0, 1, 1], [], []>} : vector<16x32xbf16>, vector<32x128xbf16>, vector<16x128xf32> -> vector<16x128xf32>
      %10 = arith.truncf %9 : vector<16x128xf32> to vector<16x128xbf16>
      %c0_11 = arith.constant 0 : index
      %c0_12 = arith.constant 0 : index
      %11 = vector.load %arg6[%c0_11, %c0_12] : memref<16x128xbf16, #tpu.memory_space<vmem>>, vector<16x128xbf16>
      tpu.vector_store %arg6[%c0_11, %c0_12], %10 {strides = array<i32>} : memref<16x128xbf16, #tpu.memory_space<vmem>>, vector<16x128xbf16>,
    } else {
    }
    %c0 = arith.constant 0 : index
    %c0_1 = arith.constant 0 : index
    %3 = vector.load %arg6[%c0, %c0_1] : memref<16x128xbf16, #tpu.memory_space<vmem>>, vector<16x128xbf16>
    %c0_2 = arith.constant 0 : index
    %c0_3 = arith.constant 0 : index
    %4 = vector.load %arg4[%c0_2, %c0_3] : memref<128x128xbf16, #tpu.memory_space<vmem>>, vector<128x128xbf16>
    %cst = arith.constant dense<0.000000e+00> : vector<16x128xf32>
    %5 = tpu.matmul %3, %4, %cst {dimension_numbers = #tpu.dot_dimension_numbers<[1], [0], [0], [1], [0, 0, 1, 1], [], []>} : vector<16x128xbf16>, vector<128x128xbf16>, vector<16x128xf32> -> vector<16x128xf32>
    %c0_4 = arith.constant 0 : index
    %c0_5 = arith.constant 0 : index
    %6 = vector.load %arg5[%c0_4, %c0_5] : memref<16x128xf32, #tpu.memory_space<vmem>>, vector<16x128xf32>
    tpu.vector_store %arg5[%c0_4, %c0_5], %5 {strides = array<i32>} : memref<16x128xf32, #tpu.memory_space<vmem>>, vector<16x128xf32>,
    return
  }
  func.func @transform_0(%arg0: i32, %arg1: i32) -> (i32, i32) {
    %c0_i32 = arith.constant 0 : i32
    %c0_i32_0 = arith.constant 0 : i32
    return %arg0, %c0_i32 : i32, i32
  }
  func.func @transform_1(%arg0: i32, %arg1: i32) -> (i32, i32) {
    %c0_i32 = arith.constant 0 : i32
    %c0_i32_0 = arith.constant 0 : i32
    %c0_i32_1 = arith.constant 0 : i32
    return %c0_i32, %c0_i32_0 : i32, i32
  }
  func.func @transform_2(%arg0: i32, %arg1: i32) -> (i32, i32) {
    %c0_i32 = arith.constant 0 : i32
    %c0_i32_0 = arith.constant 0 : i32
    return %c0_i32, %arg1 : i32, i32
  }
  func.func @transform_3(%arg0: i32, %arg1: i32) -> (i32, i32) {
    %c0_i32 = arith.constant 0 : i32
    return %arg0, %arg1 : i32, i32
  }
}

</mosaic_0001>

<bundles_post_ra>
// kernel: tpu_custom_call.1
= control target key start
LH: loop header
LB: loop body
LE: loop exit
PB: predicated region body
PF: predicated region fallthrough
CT: control target
= control target key end

     0   :  { %8 = vsyncpa [#allocation4], 0  ;;  %s436_s0 = inlined_call_operand.hbm [shape: bf16[16,32], index: 0, kind: input, shape index: {}]   ;;  %s437_s1 = inlined_call_operand.hbm [shape: bf16[32,128], index: 1, kind: input, shape index: {}]   ;;  %s438_s2 = inlined_call_operand.hbm [shape: bf16[128,128], index: 2, kind: input, shape index: {}]   ;;  %s439_s3 = inlined_call_operand.hbm [shape: f32[16,128], index: 3, kind: output, shape index: {}]  }
   0x1   :  { %9 = vsyncpa [#allocation7], 0 }
   0x2   :  { %10 = vsyncpa [#allocation5], 0  ;;  %s28_s14 = sshll.u32 %s437_s1, 4  ;;  %s396_s15 = smov [#allocation6]   ;;  %s29_s14 = int_to_ptr.hbm [resolvable:$true] %s28_s14 }
   0x3   :  { %s30_s16 = sshll.u32 %s396_s15, 4  ;;  %s15_s19 = sshll.u32 %s436_s0, 4  ;;  %s31_s16 = int_to_ptr.vmem [resolvable:$true] %s30_s16  ;;  %s16_s19 = int_to_ptr.hbm [resolvable:$true] %s15_s19 }
   0x4   :  { %s397_s20 = smov 64   ;;  %s398_s21 = smov 4  }
   0x5   :  { %36 = dma.hbm_to_vmem [thread:$0]  %s29_s14, 256, %s31_s16, [#allocation7], %s397_s20, %s397_s20, %s398_s21  }
   0x6   :  { %s399_s22 = smov [#allocation3]   ;;  %s41_s26 = sshll.u32 %s438_s2, 4  ;;  %s42_s26 = int_to_ptr.hbm [resolvable:$true] %s41_s26 }
   0x7   :  { %s17_s23 = sshll.u32 %s399_s22, 4  ;;  %s400_s1 = smov [#allocation8]   ;;  %s18_s23 = int_to_ptr.vmem [resolvable:$true] %s17_s23 }
   0x8   :  { %23 = dma.hbm_to_vmem [thread:$0]  %s16_s19, 128, %s18_s23, [#allocation4], %s397_s20, %s397_s20, %s398_s21  }
   0x9   :  { %s43_s27 = sshll.u32 %s400_s1, 4  ;;  %s44_s27 = int_to_ptr.vmem [resolvable:$true] %s43_s27 }
   0xa   :  { %49 = dma.hbm_to_vmem [thread:$0]  %s42_s26, 1024, %s44_s27, [#allocation7], %s397_s20, %s397_s20, %s398_s21  }
   0xb   :  { %390 = dma.done.wait [#allocation4], 128  }
   0xc   :  { %391 = vsyncadd [#allocation4], 4294967168 }
   0xd   :  { %392 = dma.done.wait [#allocation7], 1280  }
   0xe   :  { %393 = vsyncadd [#allocation7], 4294966016  ;;  %v271_v0 = vld [vmem:[#allocation6 + $0x8] sm:$0xff]  ;;  %v270_v2 = vld [vmem:[#allocation6] sm:$0xff]  ;;  %vm90_vm0 = vcmask 261120   ;;  %s401_s0 = smov [#allocation9]  }
   0xf   :  { %v280_v1 = vld [vmem:[#allocation8 + $0x38] sm:$0xff]  ;;  %100 = vmatpush.bf16.msra.mxu0 %v271_v0  ;;  %v279_v3 = vld [vmem:[#allocation8 + $0x30] sm:$0xff]  ;;  %v269_v4 = vld [vmem:[#allocation3] sm:$0xff]  ;;  %s204_s2 = sshll.u32 %s401_s0, 4  ;;  %s206_s30 = sshll.u32 %s439_s3, 4  ;;  %s205_s2 = int_to_ptr.vmem [resolvable:$true] %s204_s2  ;;  %s207_s30 = int_to_ptr.hbm [resolvable:$true] %s206_s30 }
  0x10   :  { %184 = vmatpush.bf16.msra.mxu1 %v280_v1  ;;  %v278_v5 = vld [vmem:[#allocation8 + $0x28] sm:$0xff]  ;;  %v277_v6 = vld [vmem:[#allocation8 + $0x20] sm:$0xff]  ;;  %v276_v7 = vld [vmem:[#allocation8 + $0x18] sm:$0xff]  ;;  %s402_s4 = smov 128   ;;  %s403_s5 = smov 8  }
  0x11   :  { %v275_v8 = vld [vmem:[#allocation8 + $0x10] sm:$0xff]  ;;  %v274_v9 = vld [vmem:[#allocation8 + $0x8] sm:$0xff]  ;;  %v273_v10 = vld [vmem:[#allocation8] sm:$0xff] }
  0x13   :  { %101 = vmatpush.bf16.msra.mxu0 %v270_v2 }
  0x14   :  { %185 = vmatpush.bf16.msra.mxu1 %v279_v3 }
  0x16   :  { %232 = vmatmul.msk.bf16.vlgmr.msra.gmra.mxu0 %vm90_vm0, %v269_v4 }
  0x18   :  { %186 = vmatpush.bf16.msra.mxu1 %v278_v5 }
  0x1c   :  { %187 = vmatpush.bf16.msra.mxu1 %v277_v6 }
  0x20   :  { %188 = vmatpush.bf16.msra.mxu1 %v276_v7 }
  0x24   :  { %189 = vmatpush.bf16.msra.mxu1 %v275_v8 }
  0x28   :  { %190 = vmatpush.bf16.msra.mxu1 %v274_v9 }
  0x2c   :  { %191 = vmatpush.bf16.msra.mxu1 %v273_v10 }
  0x93   :  { %v103_v11 = vpop.f32.mrf.mxu0 }
  0x9b   :  { %v105_v12 = vpop.f32.mrf.mxu0 }
  0x9c   :  { %v284_v13 = vpack.c.bf16 %v105_v12, %v103_v11 }
  0x9e   :  { %285 = vst [vmem:[#allocation2] sm:$0xff] %v284_v13  }
  0xa5   :  { %v272_v14 = vld [vmem:[#allocation2] sm:$0xff] }
  0xa6   :  { %192 = vmatmul.bf16.vlgmr.msra.gmra.mxu1 %v272_v14 }
 0x123   :  { %v193_v15 = vpop.f32.mrf.mxu1 }
 0x124   :  { %198 = vst [vmem:[#allocation9] sm:$0xff] %v193_v15 }
 0x12b   :  { %v195_v16 = vpop.f32.mrf.mxu1 }
 0x12c   :  { %199 = vst [vmem:[#allocation9 + $0x8] sm:$0xff] %v195_v16 }
 0x12d   :  { %212 = dma.vmem_to_hbm [thread:$0]  %s205_s2, 256, %s207_s30, [#allocation5], %s402_s4, %s402_s4, %s403_s5  }
 0x12e   :  { %394 = dma.done.wait [#allocation5], 256  }
 0x12f   :  { %395 = vsyncadd [#allocation5], 4294967040 }
 0x130   :  { %217 = vsyncpa [#allocation4], 1 }
 0x131   :  { %218 = vsyncpa [#allocation7], 1 }
 0x132   :  { %219 = vsyncpa [#allocation5], 1 }

// kernel: tpu_custom_call.1
= control target key start
LH: loop header
LB: loop body
LE: loop exit
PB: predicated region body
PF: predicated region fallthrough
CT: control target
= control target key end

     0   :  { %8 = vsyncpa [#allocation4], 0  ;;  %s436_s0 = inlined_call_operand.hbm [shape: bf16[16,32], index: 0, kind: input, shape index: {}]   ;;  %s437_s1 = inlined_call_operand.hbm [shape: bf16[32,128], index: 1, kind: input, shape index: {}]   ;;  %s438_s2 = inlined_call_operand.hbm [shape: bf16[128,128], index: 2, kind: input, shape index: {}]   ;;  %s439_s3 = inlined_call_operand.hbm [shape: f32[16,128], index: 3, kind: output, shape index: {}]  }
   0x1   :  { %9 = vsyncpa [#allocation7], 0 }
   0x2   :  { %10 = vsyncpa [#allocation5], 0  ;;  %s28_s14 = sshll.u32 %s437_s1, 4  ;;  %s396_s15 = smov [#allocation6]   ;;  %s29_s14 = int_to_ptr.hbm [resolvable:$true] %s28_s14 }
   0x3   :  { %s30_s16 = sshll.u32 %s396_s15, 4  ;;  %s15_s19 = sshll.u32 %s436_s0, 4  ;;  %s31_s16 = int_to_ptr.vmem [resolvable:$true] %s30_s16  ;;  %s16_s19 = int_to_ptr.hbm [resolvable:$true] %s15_s19 }
   0x4   :  { %s397_s20 = smov 64   ;;  %s398_s21 = smov 4  }
   0x5   :  { %36 = dma.hbm_to_vmem [thread:$0]  %s29_s14, 256, %s31_s16, [#allocation7], %s397_s20, %s397_s20, %s398_s21  }
   0x6   :  { %s399_s22 = smov [#allocation3]   ;;  %s41_s26 = sshll.u32 %s438_s2, 4  ;;  %s42_s26 = int_to_ptr.hbm [resolvable:$true] %s41_s26 }
   0x7   :  { %s17_s23 = sshll.u32 %s399_s22, 4  ;;  %s400_s1 = smov [#allocation8]   ;;  %s18_s23 = int_to_ptr.vmem [resolvable:$true] %s17_s23 }
   0x8   :  { %23 = dma.hbm_to_vmem [thread:$0]  %s16_s19, 128, %s18_s23, [#allocation4], %s397_s20, %s397_s20, %s398_s21  }
   0x9   :  { %s43_s27 = sshll.u32 %s400_s1, 4  ;;  %s44_s27 = int_to_ptr.vmem [resolvable:$true] %s43_s27 }
   0xa   :  { %49 = dma.hbm_to_vmem [thread:$0]  %s42_s26, 1024, %s44_s27, [#allocation7], %s397_s20, %s397_s20, %s398_s21  }
   0xb   :  { %390 = dma.done.wait [#allocation4], 128  }
   0xc   :  { %391 = vsyncadd [#allocation4], 4294967168 }
   0xd   :  { %392 = dma.done.wait [#allocation7], 1280  }
   0xe   :  { %393 = vsyncadd [#allocation7], 4294966016  ;;  %v271_v0 = vld [vmem:[#allocation6 + $0x8] sm:$0xff]  ;;  %v270_v2 = vld [vmem:[#allocation6] sm:$0xff]  ;;  %vm90_vm0 = vcmask 261120   ;;  %s401_s0 = smov [#allocation9]  }
   0xf   :  { %v280_v1 = vld [vmem:[#allocation8 + $0x38] sm:$0xff]  ;;  %100 = vmatpush.bf16.msra.mxu0 %v271_v0  ;;  %v279_v3 = vld [vmem:[#allocation8 + $0x30] sm:$0xff]  ;;  %v269_v4 = vld [vmem:[#allocation3] sm:$0xff]  ;;  %s204_s2 = sshll.u32 %s401_s0, 4  ;;  %s206_s30 = sshll.u32 %s439_s3, 4  ;;  %s205_s2 = int_to_ptr.vmem [resolvable:$true] %s204_s2  ;;  %s207_s30 = int_to_ptr.hbm [resolvable:$true] %s206_s30 }
  0x10   :  { %184 = vmatpush.bf16.msra.mxu1 %v280_v1  ;;  %v278_v5 = vld [vmem:[#allocation8 + $0x28] sm:$0xff]  ;;  %v277_v6 = vld [vmem:[#allocation8 + $0x20] sm:$0xff]  ;;  %v276_v7 = vld [vmem:[#allocation8 + $0x18] sm:$0xff]  ;;  %s402_s4 = smov 128   ;;  %s403_s5 = smov 8  }
  0x11   :  { %v275_v8 = vld [vmem:[#allocation8 + $0x10] sm:$0xff]  ;;  %v274_v9 = vld [vmem:[#allocation8 + $0x8] sm:$0xff]  ;;  %v273_v10 = vld [vmem:[#allocation8] sm:$0xff] }
  0x13   :  { %101 = vmatpush.bf16.msra.mxu0 %v270_v2 }
  0x14   :  { %185 = vmatpush.bf16.msra.mxu1 %v279_v3 }
  0x16   :  { %232 = vmatmul.msk.bf16.vlgmr.msra.gmra.mxu0 %vm90_vm0, %v269_v4 }
  0x18   :  { %186 = vmatpush.bf16.msra.mxu1 %v278_v5 }
  0x1c   :  { %187 = vmatpush.bf16.msra.mxu1 %v277_v6 }
  0x20   :  { %188 = vmatpush.bf16.msra.mxu1 %v276_v7 }
  0x24   :  { %189 = vmatpush.bf16.msra.mxu1 %v275_v8 }
  0x28   :  { %190 = vmatpush.bf16.msra.mxu1 %v274_v9 }
  0x2c   :  { %191 = vmatpush.bf16.msra.mxu1 %v273_v10 }
  0x93   :  { %v103_v11 = vpop.f32.mrf.mxu0 }
  0x9b   :  { %v105_v12 = vpop.f32.mrf.mxu0 }
  0x9c   :  { %v284_v13 = vpack.c.bf16 %v105_v12, %v103_v11 }
  0x9e   :  { %285 = vst [vmem:[#allocation2] sm:$0xff] %v284_v13  }
  0xa5   :  { %v272_v14 = vld [vmem:[#allocation2] sm:$0xff] }
  0xa6   :  { %192 = vmatmul.bf16.vlgmr.msra.gmra.mxu1 %v272_v14 }
 0x123   :  { %v193_v15 = vpop.f32.mrf.mxu1 }
 0x124   :  { %198 = vst [vmem:[#allocation9] sm:$0xff] %v193_v15 }
 0x12b   :  { %v195_v16 = vpop.f32.mrf.mxu1 }
 0x12c   :  { %199 = vst [vmem:[#allocation9 + $0x8] sm:$0xff] %v195_v16 }
 0x12d   :  { %212 = dma.vmem_to_hbm [thread:$0]  %s205_s2, 256, %s207_s30, [#allocation5], %s402_s4, %s402_s4, %s403_s5  }
 0x12e   :  { %394 = dma.done.wait [#allocation5], 256  }
 0x12f   :  { %395 = vsyncadd [#allocation5], 4294967040 }
 0x130   :  { %217 = vsyncpa [#allocation4], 1 }
 0x131   :  { %218 = vsyncpa [#allocation7], 1 }
 0x132   :  { %219 = vsyncpa [#allocation5], 1 }

</bundles_post_ra>
